<compile_context>
chip_gen: v5e
topology: v5e:2x2
jax: 0.10.0
libtpu: 0.0.40
codegen_flags: <defaults>
</compile_context>

<pallas_src>
import jax
import jax.numpy as jnp
from jax import lax
from jax.experimental import pallas as pl
from jax.experimental.pallas import tpu as pltpu

BIN_SCORE = 100.0   # matches 100 * torch.ones(1, 1, 1)
EPS_NORM = 1e-12    # torch.nn.functional.normalize default eps


def _cvw_kernel(v0_ref, y_ref, grid_ref, out_ref):
    """One (batch b, query-tile i) step.

    v0_ref   : (D, TQ)     raw vol0 columns of this query tile
    y_ref    : (D+2, HW)   bf16 [normalize(vol1, dim=ch) ; grid], const over i
    grid_ref : (2, TQ)     f32 grid columns of this tile (exact copy to output)
    out_ref  : (2D+5, TQ)  fused output [vol0n | vol1w | pos_enc | grid | max_score]
    """
    D, TQ = v0_ref.shape

    # --- F.normalize(vol0, dim=1) on this tile (f32 for output, bf16 for MXU) ---
    v0 = v0_ref[...].astype(jnp.float32)                              # (D, TQ)
    ssq0 = jnp.sum(v0 * v0, axis=0, keepdims=True)                    # (1, TQ)
    v0n = v0 * lax.rsqrt(jnp.maximum(ssq0, EPS_NORM * EPS_NORM))      # (D, TQ)

    # --- correlation scores: s[i, j] = <v0n[:, i], v1n[:, j]>  (MXU, bf16) ---
    # Only the small (D, TQ) operand gets transposed; v1n stays (K=D, N=HW).
    v1n_b = y_ref[0:D, :]                                             # (D, HW) bf16
    v0n_tb = jnp.transpose(v0n).astype(jnp.bfloat16)                  # (TQ, D)
    s = jnp.dot(v0n_tb, v1n_b, preferred_element_type=jnp.float32)    # (TQ, HW)

    # --- dustbin-augmented softmax statistics (per query row) ---
    # The appended bin *row* of the torch module is sliced away downstream, so
    # only the bin column (score BIN_SCORE, feature 0) has to be accounted for.
    bin_score = jnp.float32(BIN_SCORE)
    rowmax = jnp.max(s, axis=1, keepdims=True)                        # (TQ, 1)
    m = jnp.maximum(rowmax, bin_score)
    e = jnp.exp(s - m)                                                # (TQ, HW)
    e_bin = jnp.exp(bin_score - m)                                    # (TQ, 1)
    denom = jnp.sum(e, axis=1, keepdims=True) + e_bin                 # (TQ, 1)
    r = pl.reciprocal(denom, approx=True)                             # EUP rcp
    inv = r * (2.0 - denom * r)                                       # + Newton step

    # --- fused warp + position-encoder matmul, denominator deferred ---
    # acc[c, i] = sum_j y[c, j] * e[i, j]   (trans_b / NT form: no HW^2
    # transpose, no materialized prob matrix p, no tiny separate pe matmul).
    acc = lax.dot_general(
        y_ref[...], e.astype(jnp.bfloat16),
        (((1,), (1,)), ((), ())),
        preferred_element_type=jnp.float32)                           # (D+2, TQ)

    inv_row = jnp.transpose(inv)                                      # (1, TQ)
    acc = acc * inv_row

    # --- max score over the dustbin-extended row (reuses the score row-max) ---
    ms = jnp.transpose(jnp.maximum(jnp.exp(rowmax - m), e_bin)) * inv_row  # (1, TQ)

    # --- fused output write: [vol0n, vol1w, pos_encoder, grid, max_score] ---
    out_dtype = out_ref.dtype
    out_ref[0:D, :] = v0n.astype(out_dtype)
    out_ref[D:2 * D, :] = acc[0:D, :].astype(out_dtype)
    out_ref[2 * D:2 * D + 2, :] = acc[D:D + 2, :].astype(out_dtype)
    out_ref[2 * D + 2:2 * D + 4, :] = grid_ref[...].astype(out_dtype)
    out_ref[2 * D + 4:2 * D + 5, :] = ms.astype(out_dtype)


def _pick_tq(hw: int) -> int:
    """Lane-aligned query tile that divides HW and keeps the (TQ, HW) score
    slab comfortably inside VMEM on v5e / v6e / v7x."""
    for tq in (256, 512, 128):
        if hw % tq == 0:
            return tq
    return hw   # fallback: single tile (block == full dim is always legal)


def correlation_volume_warping(vol0, vol1, *, tq=None):
    assert vol0.shape == vol1.shape, "Feature volumes shape must match"
    B, D, H, W = vol0.shape
    HW = H * W
    C_out = 2 * D + 5

    v0 = vol0.reshape(B, D, HW)                         # keep source dtype
    v1 = vol1.reshape(B, D, HW).astype(jnp.float32)

    # torch.meshgrid(u, v) default 'ij' indexing
    u = jnp.linspace(-1.0, 1.0, H, dtype=jnp.float32)
    v = jnp.linspace(-1.0, 1.0, W, dtype=jnp.float32)
    uu, vv = jnp.meshgrid(u, v, indexing="ij")
    grid2d = jnp.stack([uu, vv], axis=0).reshape(2, HW)  # (2, HW) f32

    # F.normalize(vol1, dim=1) once, stacked with the grid and cast to bf16:
    # one MXU-side operand, constant across all query tiles of a batch.
    v1n = v1 / jnp.maximum(
        jnp.sqrt(jnp.sum(v1 * v1, axis=1, keepdims=True)), EPS_NORM)
    y = jnp.concatenate(
        [v1n, jnp.broadcast_to(grid2d[None], (B, 2, HW))], axis=1
    ).astype(jnp.bfloat16)                               # (B, D+2, HW)

    if tq is None:
        tq = _pick_tq(HW)
    assert HW % tq == 0
    n_q = HW // tq

    in_bytes = v0.size * v0.dtype.itemsize + y.size * 2 + grid2d.size * 4
    out_bytes = B * C_out * HW * 4
    cost = pl.CostEstimate(
        flops=2 * B * (2 * D + 2) * HW * HW,
        transcendentals=B * HW * HW,
        bytes_accessed=int(in_bytes + out_bytes),
    )

    out = pl.pallas_call(
        _cvw_kernel,
        out_shape=jax.ShapeDtypeStruct((B, C_out, HW), jnp.float32),
        grid_spec=pltpu.PrefetchScalarGridSpec(
            num_scalar_prefetch=0,
            grid=(B, n_q),                               # query tiles innermost:
            in_specs=[                                   # y is not re-DMA'd per tile
                pl.BlockSpec((None, D, tq), lambda b, i: (b, 0, i)),
                pl.BlockSpec((None, D + 2, HW), lambda b, i: (b, 0, 0)),
                pl.BlockSpec((2, tq), lambda b, i: (0, i)),
            ],
            out_specs=pl.BlockSpec((None, C_out, tq), lambda b, i: (b, 0, i)),
        ),
        compiler_params=pltpu.CompilerParams(
            dimension_semantics=("parallel", "parallel"),
            vmem_limit_bytes=48 * 1024 * 1024,
        ),
        cost_estimate=cost,
    )(v0, y, grid2d)

    return out.reshape(B, C_out, H, W)


def _reference(vol0, vol1):
    # pure-JAX mirror of the PyTorch forward (same cfg), for validation
    B, D, H, W = vol0.shape
    HW = H * W
    v0 = vol0.reshape(B, D, HW)
    v1 = vol1.reshape(B, D, HW)
    v0 = v0 / jnp.maximum(jnp.linalg.norm(v0, axis=1, keepdims=True), EPS_NORM)
    v1 = v1 / jnp.maximum(jnp.linalg.norm(v1, axis=1, keepdims=True), EPS_NORM)
    cv = jnp.einsum("bdi,bdj->bij", v0, v1)
    cv = jnp.concatenate([cv, jnp.full((B, 1, HW), BIN_SCORE, jnp.float32)], axis=1)
    cv = jnp.concatenate([cv, jnp.full((B, HW + 1, 1), BIN_SCORE, jnp.float32)], axis=2)
    v1e = jnp.concatenate([v1, jnp.zeros((B, D, 1), jnp.float32)], axis=2)
    p = jax.nn.softmax(cv, axis=2)
    v1w = jnp.einsum("bdj,bij->bdi", v1e, p)[:, :, :-1]
    u = jnp.linspace(-1.0, 1.0, H, dtype=jnp.float32)
    vv_ = jnp.linspace(-1.0, 1.0, W, dtype=jnp.float32)
    uu, vv = jnp.meshgrid(u, vv_, indexing="ij")
    g = jnp.broadcast_to(jnp.stack([uu, vv], 0).reshape(2, HW)[None], (B, 2, HW))
    pe = jnp.einsum("bcj,bij->bci", g, p[:, :HW, :HW])
    ms = jnp.transpose(jnp.max(p, axis=2, keepdims=True), (0, 2, 1))[..., :HW]
    agg = jnp.concatenate([v0, v1w, pe, g, ms], axis=1)
    return agg.reshape(B, -1, H, W)


if __name__ == "__main__":
    key = jax.random.PRNGKey(0)
    k0, k1 = jax.random.split(key)
    B, D, H, W = 2, 4, 8, 8
    vol0 = jax.random.normal(k0, (B, D, H, W), dtype=jnp.float32)
    vol1 = jax.random.normal(k1, (B, D, H, W), dtype=jnp.float32)

    out = jax.block_until_ready(correlation_volume_warping(vol0, vol1))
    assert out.shape == (B, 2 * D + 5, H, W), out.shape

    ref = jax.block_until_ready(_reference(vol0, vol1))
    err = float(jnp.max(jnp.abs(out - ref)))
    assert jnp.allclose(out, ref, atol=5e-5, rtol=1e-4), err

    print("KERNEL_OK")
</pallas_src>

<mosaic_0001>
module attributes {stable_mosaic.version = 11 : i64} {
  func.func @_cvw_kernel(%arg0: i32, %arg1: i32, %arg2: memref<1x4x64xf32, #tpu.memory_space<vmem>>, %arg3: memref<1x6x64xbf16, #tpu.memory_space<vmem>>, %arg4: memref<2x64xf32, #tpu.memory_space<vmem>>, %arg5: memref<1x13x64xf32, #tpu.memory_space<vmem>>) attributes {dimension_semantics = [#tpu.dimension_semantics<parallel>, #tpu.dimension_semantics<parallel>], iteration_bounds = array<i64: 2, 1>, scalar_prefetch = 0 : i64, scratch_operands = 0 : i64, tpu.core_type = #tpu.core_type<tc>, window_params = [{transform_indices = @transform_0, window_bounds = array<i64: 1, 4, 64>}, {transform_indices = @transform_1, window_bounds = array<i64: 1, 6, 64>}, {transform_indices = @transform_2, window_bounds = array<i64: 2, 64>}, {transform_indices = @transform_3, window_bounds = array<i64: 1, 13, 64>}]} {
    %c0 = arith.constant 0 : index
    %c0_0 = arith.constant 0 : index
    %c0_1 = arith.constant 0 : index
    %0 = vector.load %arg2[%c0, %c0_0, %c0_1] : memref<1x4x64xf32, #tpu.memory_space<vmem>>, vector<1x4x64xf32>
    %1 = vector.shape_cast %0 : vector<1x4x64xf32> to vector<4x64xf32>
    %2 = arith.mulf %1, %1 : vector<4x64xf32>
    %cst = arith.constant dense<0.000000e+00> : vector<64xf32>
    %3 = vector.multi_reduction <add>, %2, %cst [0] : vector<4x64xf32> to vector<64xf32>
    %4 = vector.shape_cast %3 : vector<64xf32> to vector<1x64xf32>
    %cst_2 = arith.constant 1.000000e-24 : f32
    %5 = vector.broadcast %cst_2 : f32 to vector<1x64xf32>
    %6 = arith.maximumf %4, %5 : vector<1x64xf32>
    %7 = math.rsqrt %6 : vector<1x64xf32>
    %8 = vector.broadcast %7 : vector<1x64xf32> to vector<4x64xf32>
    %9 = arith.mulf %1, %8 : vector<4x64xf32>
    %c0_3 = arith.constant 0 : index
    %c0_4 = arith.constant 0 : index
    %c0_5 = arith.constant 0 : index
    %10 = vector.load %arg3[%c0_3, %c0_4, %c0_5] : memref<1x6x64xbf16, #tpu.memory_space<vmem>>, vector<1x4x64xbf16>
    %11 = vector.shape_cast %10 : vector<1x4x64xbf16> to vector<4x64xbf16>
    %12 = tpu.transpose %9, [1, 0] : vector<4x64xf32> -> vector<64x4xf32>
    %13 = arith.truncf %12 : vector<64x4xf32> to vector<64x4xbf16>
    %cst_6 = arith.constant dense<0.000000e+00> : vector<64x64xf32>
    %14 = tpu.matmul %13, %11, %cst_6 {dimension_numbers = #tpu.dot_dimension_numbers<[1], [0], [0], [1], [0, 0, 1, 1], [], []>} : vector<64x4xbf16>, vector<4x64xbf16>, vector<64x64xf32> -> vector<64x64xf32>
    %cst_7 = arith.constant dense<0xFF800000> : vector<64xf32>
    %15 = vector.multi_reduction <maximumf>, %14, %cst_7 [1] : vector<64x64xf32> to vector<64xf32>
    %16 = vector.shape_cast %15 : vector<64xf32> to vector<64x1xf32>
    %cst_8 = arith.constant 1.000000e+02 : f32
    %17 = vector.broadcast %cst_8 : f32 to vector<64x1xf32>
    %18 = arith.maximumf %16, %17 : vector<64x1xf32>
    %19 = vector.broadcast %18 : vector<64x1xf32> to vector<64x64xf32>
    %20 = arith.subf %14, %19 : vector<64x64xf32>
    %21 = math.exp %20 : vector<64x64xf32>
    %cst_9 = arith.constant 1.000000e+02 : f32
    %22 = vector.broadcast %cst_9 : f32 to vector<64x1xf32>
    %23 = arith.subf %22, %18 : vector<64x1xf32>
    %24 = math.exp %23 : vector<64x1xf32>
    %cst_10 = arith.constant dense<0.000000e+00> : vector<64xf32>
    %25 = vector.multi_reduction <add>, %21, %cst_10 [1] : vector<64x64xf32> to vector<64xf32>
    %26 = vector.shape_cast %25 : vector<64xf32> to vector<64x1xf32>
    %27 = arith.addf %26, %24 : vector<64x1xf32>
    %28 = tpu.reciprocal %27 {approx = true} : vector<64x1xf32> -> vector<64x1xf32>
    %29 = arith.mulf %27, %28 : vector<64x1xf32>
    %cst_11 = arith.constant 2.000000e+00 : f32
    %30 = vector.broadcast %cst_11 : f32 to vector<64x1xf32>
    %31 = arith.subf %30, %29 : vector<64x1xf32>
    %32 = arith.mulf %28, %31 : vector<64x1xf32>
    %c0_12 = arith.constant 0 : index
    %c0_13 = arith.constant 0 : index
    %c0_14 = arith.constant 0 : index
    %33 = vector.load %arg3[%c0_12, %c0_13, %c0_14] : memref<1x6x64xbf16, #tpu.memory_space<vmem>>, vector<1x6x64xbf16>
    %34 = vector.shape_cast %33 : vector<1x6x64xbf16> to vector<6x64xbf16>
    %35 = arith.truncf %21 : vector<64x64xf32> to vector<64x64xbf16>
    %cst_15 = arith.constant dense<0.000000e+00> : vector<6x64xf32>
    %36 = tpu.matmul %34, %35, %cst_15 {dimension_numbers = #tpu.dot_dimension_numbers<[1], [1], [0], [0], [0, 0, 1, 0], [], []>} : vector<6x64xbf16>, vector<64x64xbf16>, vector<6x64xf32> -> vector<6x64xf32>
    %37 = tpu.transpose %32, [1, 0] : vector<64x1xf32> -> vector<1x64xf32>
    %38 = vector.broadcast %37 : vector<1x64xf32> to vector<6x64xf32>
    %39 = arith.mulf %36, %38 : vector<6x64xf32>
    %40 = arith.subf %16, %18 : vector<64x1xf32>
    %41 = math.exp %40 : vector<64x1xf32>
    %42 = arith.maximumf %41, %24 : vector<64x1xf32>
    %43 = tpu.transpose %42, [1, 0] : vector<64x1xf32> -> vector<1x64xf32>
    %44 = arith.mulf %43, %37 : vector<1x64xf32>
    %c0_16 = arith.constant 0 : index
    %c0_17 = arith.constant 0 : index
    %c0_18 = arith.constant 0 : index
    %45 = vector.load %arg5[%c0_16, %c0_17, %c0_18] : memref<1x13x64xf32, #tpu.memory_space<vmem>>, vector<1x4x64xf32>
    %46 = vector.shape_cast %45 : vector<1x4x64xf32> to vector<4x64xf32>
    %47 = vector.shape_cast %9 : vector<4x64xf32> to vector<1x4x64xf32>
    tpu.vector_store %arg5[%c0_16, %c0_17, %c0_18], %47 {strides = array<i32>} : memref<1x13x64xf32, #tpu.memory_space<vmem>>, vector<1x4x64xf32>,
    %48 = vector.extract_strided_slice %39 {offsets = [0, 0], sizes = [4, 64], strides = [1, 1]} : vector<6x64xf32> to vector<4x64xf32>
    %c0_19 = arith.constant 0 : index
    %c4 = arith.constant 4 : index
    %c0_20 = arith.constant 0 : index
    %49 = vector.load %arg5[%c0_19, %c4, %c0_20] : memref<1x13x64xf32, #tpu.memory_space<vmem>>, vector<1x4x64xf32>
    %50 = vector.shape_cast %49 : vector<1x4x64xf32> to vector<4x64xf32>
    %51 = vector.shape_cast %48 : vector<4x64xf32> to vector<1x4x64xf32>
    tpu.vector_store %arg5[%c0_19, %c4, %c0_20], %51 {strides = array<i32>} : memref<1x13x64xf32, #tpu.memory_space<vmem>>, vector<1x4x64xf32>,
    %52 = vector.extract_strided_slice %39 {offsets = [4, 0], sizes = [2, 64], strides = [1, 1]} : vector<6x64xf32> to vector<2x64xf32>
    %c0_21 = arith.constant 0 : index
    %c8 = arith.constant 8 : index
    %c0_22 = arith.constant 0 : index
    %53 = vector.load %arg5[%c0_21, %c8, %c0_22] : memref<1x13x64xf32, #tpu.memory_space<vmem>>, vector<1x2x64xf32>
    %54 = vector.shape_cast %53 : vector<1x2x64xf32> to vector<2x64xf32>
    %55 = vector.shape_cast %52 : vector<2x64xf32> to vector<1x2x64xf32>
    tpu.vector_store %arg5[%c0_21, %c8, %c0_22], %55 {strides = array<i32>} : memref<1x13x64xf32, #tpu.memory_space<vmem>>, vector<1x2x64xf32>,
    %c0_23 = arith.constant 0 : index
    %c0_24 = arith.constant 0 : index
    %56 = vector.load %arg4[%c0_23, %c0_24] : memref<2x64xf32, #tpu.memory_space<vmem>>, vector<2x64xf32>
    %c0_25 = arith.constant 0 : index
    %c10 = arith.constant 10 : index
    %c0_26 = arith.constant 0 : index
    %57 = vector.load %arg5[%c0_25, %c10, %c0_26] : memref<1x13x64xf32, #tpu.memory_space<vmem>>, vector<1x2x64xf32>
    %58 = vector.shape_cast %57 : vector<1x2x64xf32> to vector<2x64xf32>
    %59 = vector.shape_cast %56 : vector<2x64xf32> to vector<1x2x64xf32>
    tpu.vector_store %arg5[%c0_25, %c10, %c0_26], %59 {strides = array<i32>} : memref<1x13x64xf32, #tpu.memory_space<vmem>>, vector<1x2x64xf32>,
    %c0_27 = arith.constant 0 : index
    %c12 = arith.constant 12 : index
    %c0_28 = arith.constant 0 : index
    %60 = vector.load %arg5[%c0_27, %c12, %c0_28] : memref<1x13x64xf32, #tpu.memory_space<vmem>>, vector<1x1x64xf32>
    %61 = vector.shape_cast %60 : vector<1x1x64xf32> to vector<1x64xf32>
    %62 = vector.shape_cast %44 : vector<1x64xf32> to vector<1x1x64xf32>
    tpu.vector_store %arg5[%c0_27, %c12, %c0_28], %62 {strides = array<i32>} : memref<1x13x64xf32, #tpu.memory_space<vmem>>, vector<1x1x64xf32>,
    return
  }
  func.func @transform_0(%arg0: i32, %arg1: i32) -> (i32, i32, i32) {
    %c0_i32 = arith.constant 0 : i32
    %c0_i32_0 = arith.constant 0 : i32
    return %arg0, %c0_i32, %arg1 : i32, i32, i32
  }
  func.func @transform_1(%arg0: i32, %arg1: i32) -> (i32, i32, i32) {
    %c0_i32 = arith.constant 0 : i32
    %c0_i32_0 = arith.constant 0 : i32
    %c0_i32_1 = arith.constant 0 : i32
    return %arg0, %c0_i32, %c0_i32_0 : i32, i32, i32
  }
  func.func @transform_2(%arg0: i32, %arg1: i32) -> (i32, i32) {
    %c0_i32 = arith.constant 0 : i32
    %c0_i32_0 = arith.constant 0 : i32
    return %c0_i32, %arg1 : i32, i32
  }
  func.func @transform_3(%arg0: i32, %arg1: i32) -> (i32, i32, i32) {
    %c0_i32 = arith.constant 0 : i32
    %c0_i32_0 = arith.constant 0 : i32
    return %arg0, %c0_i32, %arg1 : i32, i32, i32
  }
}

</mosaic_0001>

<bundles_post_ra>
// kernel: tpu_custom_call.1
= control target key start
LH: loop header
LB: loop body
LE: loop exit
PB: predicated region body
PF: predicated region fallthrough
CT: control target
= control target key end

     0   :  { %s887_s12 = smov 0   ;;  %s889_s13 = smov 0   ;;  %s1053_s0 = inlined_call_operand.vmem [shape: f32[2,4,64], index: 0, kind: input, shape index: {}]   ;;  %s1054_s1 = inlined_call_operand.vmem [shape: bf16[2,6,64], index: 1, kind: input, shape index: {}]   ;;  %s1055_s2 = inlined_call_operand.vmem [shape: f32[2,64], index: 2, kind: input, shape index: {}]   ;;  %s1056_s3 = inlined_call_operand.vmem [shape: f32[2,13,64], index: 3, kind: output, shape index: {}]  }
   0x1   :  { %s891_s14 = smov 0  }
   0x2 LB: > { %s25_s15 = sadd.s32 1, %s861_s13  ;;  %p738_p0 = scmp.ge.s32.totalorder %s865_s14, 1  ;;  %s865_s14 = sphi %s891_s14, %s13_s14   ;;  %s861_s13 = sphi %s889_s13, %s1058_s13   ;;  %s857_s12 = sphi %s887_s12, %s1057_s12  }
   0x3   : > { %p27_p1 = scmp.ge.s32.totalorder %s25_s15, 2  ;;  %p173_p2 = scmp.lt.s32.totalorder %s865_s14, 3 }
   0x5   : > { %s1060_s15 = smov (%p27_p1, %s25_s15), 0  ;;  %p174_p3 = pnand %p738_p0, %p173_p2 }
   0x6   : > { %p210_p4 = scmp.lt.s32.totalorder (!%p174_p3), %s857_s12, 1 }
   0x7   : > { %177 = sbr.rel (%p174_p3) target bundleno = 854 (0x356), region = 32 }
   0xc   : > { %s1062_s12 = smov (!%p210_p4, %s857_s12), 1  ;;  %vm236_vm0 = vcmask 519168   ;;  %v620_v4 = vld [vmem:[%s1055_s2] sm:$0x3]  ;;  %vm621_vm1 = vcmask 517120   ;;  %vm306_vm5 = vcmask 1041408  }
   0xd   : > { %s739_s16 = sshll.u32 %s1062_s12, 2  ;;  %s750_s20 = sshll.u32 %s1062_s12, 4  ;;  %vm293_vm6 = vcmask 31744   ;;  %vm339_vm7 = vcmask 523264   ;;  %vm623_vm8 = vcmask 516096   ;;  %vm618_vm9 = vcmask 521220  }
   0xe   : > { %s216_s19 = scalar_lea.vmem %s1053_s0, %s739_s16  ;;  %s918_s23 = scalar_lea.vmem %s1056_s3, %s750_s20 }
   0xf   : > { %v234_v0 = vld [vmem:[%s216_s19] sm:$0xf]  ;;  %622 = vst.msk [vmem:[%s918_s23 + $0xa] sm:$0x3] %vm621_vm1, %v620_v4  ;;  %s931_s28 = scalar_lea.vmem %s1054_s1, %s739_s16 }
  0x10   : > { %v235_v1 = vmul.f32 %v234_v0, %v234_v0  ;;  %v256_v19 = vld [vmem:[%s931_s28] sm:$0x3] }
  0x11   : > { %v308_v20 = vsel %vm306_vm5, %v256_v19, 0 }
  0x12   : > { %v237_v2 = vsel %vm236_vm0, %v235_v1, 0.0  ;;  %317 = vmatpush.bf16.msra.mxu0 %v308_v20  ;;  %751 = vmatpush.bf16.msra.mxu2 %v308_v20 }
  0x13   : > { %v238_v3 = vrot.slane %v237_v2, 4 }
  0x15   : > { %v239_v5 = vadd.f32 %v238_v3, %v237_v2 }
  0x17   : > { %v240_v6 = vrot.slane %v239_v5, 2 }
  0x19   : > { %v241_v7 = vadd.f32 %v240_v6, %v239_v5 }
  0x1b   : > { %v242_v8 = vrot.slane %v241_v7, 1 }
  0x1d   : > { %v243_v9 = vadd.f32 %v242_v8, %v241_v7 }
  0x1f   : > { %v244_v10 = vmax.f32 %v243_v9, 1e-24 }
  0x21   : > { %777 = vrsqrt.f32 %v244_v10  ;;  %vm251_vm2 = vweird.f32 %v244_v10 }
  0x27   : > { %v778_v11 = vpop.eup %777 }
  0x28   : > { %v246_v12 = vmul.f32 %v778_v11, %v244_v10  ;;  %vm252_vm3 = vweird.f32 %v778_v11 }
  0x29   : > { %vm253_vm4 = vmor %vm251_vm2, %vm252_vm3 }
  0x2a   : > { %v247_v13 = vmul.f32 %v778_v11, %v246_v12 }
  0x2c   : > { %v248_v14 = vmul.f32 0.5, %v247_v13 }
  0x2e   : > { %v249_v15 = vsub.f32 1.5, %v248_v14 }
  0x30   : > { %v250_v16 = vmul.f32 %v778_v11, %v249_v15 }
  0x32   : > { %v254_v17 = vsel %vm253_vm4, %v778_v11, %v250_v16 }
  0x33   : > { %v255_v18 = vmul.f32 %v254_v17, %v234_v0 }
  0x35   : > { %257 = vxpose.xlu0.b32.start.end [1/1] (short) (narrow) %v255_v18, 64  ;;  %616 = vst.msk [vmem:[%s918_s23] sm:$0xf] %vm236_vm0, %v255_v18 }
  0xd9   : > { %v273_v21 = vpop.trf.xlu0 }
  0xe1   : > { %v274_v22 = vpop.trf.xlu0 }
  0xe2   : > { %v289_v23 = vpack.c.bf16 %v274_v22, %v273_v21 }
  0xe4   : > { %743 = vmatmul.msk.bf16.vlgmr.msra.gmra.mxu0 %vm293_vm6, %v289_v23 }
  0xe9   : > { %v275_v24 = vpop.trf.xlu0 }
  0xf1   : > { %v276_v25 = vpop.trf.xlu0 }
  0xf2   : > { %v290_v26 = vpack.c.bf16 %v276_v25, %v275_v24 }
  0xf4   : > { %744 = vmatmul.msk.bf16.gmra.mxu0 %vm293_vm6, %v290_v26 }
  0xf9   : > { %v277_v27 = vpop.trf.xlu0 }
 0x101   : > { %v278_v28 = vpop.trf.xlu0 }
 0x102   : > { %v291_v29 = vpack.c.bf16 %v278_v28, %v277_v27 }
 0x104   : > { %745 = vmatmul.msk.bf16.vlgmr.msra.gmra.mxu2 %vm293_vm6, %v291_v29 }
 0x109   : > { %v279_v30 = vpop.trf.xlu0 }
 0x111   : > { %v280_v31 = vpop.trf.xlu0 }
 0x112   : > { %v292_v32 = vpack.c.bf16 %v280_v31, %v279_v30 }
 0x114   : > { %746 = vmatmul.msk.bf16.gmra.mxu2 %vm293_vm6, %v292_v32 }
 0x161   : > { %v934_v33 = vpop.f32.mrf.mxu0 }
 0x162   : > { %v340_v43 = vsel %vm339_vm7, %v934_v33, -inf }
 0x169   : > { %v938_v35 = vpop.f32.mrf.mxu0 }
 0x16a   : > { %v343_v48 = vsel %vm339_vm7, %v938_v35, -inf }
 0x171   : > { %v944_v38 = vpop.f32.mrf.mxu0 }
 0x172   : > { %v346_v40 = vsel %vm339_vm7, %v944_v38, -inf }
 0x179   : > { %v954_v46 = vpop.f32.mrf.mxu0 }
 0x17a   : > { %v349_v47 = vsel %vm339_vm7, %v954_v46, -inf }
 0x187   : > { %v936_v34 = vpop.f32.mrf.mxu2 }
 0x188   : > { %v352_v45 = vsel %vm339_vm7, %v936_v34, -inf }
 0x18f   : > { %v940_v36 = vpop.f32.mrf.mxu2 }
 0x190   : > { %v355_v37 = vsel %vm339_vm7, %v940_v36, -inf }
 0x191   : > { %356 = vmax.xlane.f32.xlu2 %v355_v37 }
 0x197   : > { %v334_v39 = vpop.f32.mrf.mxu2 }
 0x198   : > { %v358_v41 = vsel %vm339_vm7, %v334_v39, -inf }
 0x199   : > { %347 = vmax.xlane.f32.xlu2 %v346_v40  ;;  %359 = vmax.xlane.f32.xlu0 %v358_v41 }
 0x19f   : > { %v336_v42 = vpop.f32.mrf.mxu2 }
 0x1a0   : > { %v361_v44 = vsel %vm339_vm7, %v336_v42, -inf }
 0x1a1   : > { %341 = vmax.xlane.f32.xlu2 %v340_v43  ;;  %362 = vmax.xlane.f32.xlu1 %v361_v44 }
 0x1a9   : > { %353 = vmax.xlane.f32.xlu1 %v352_v45 }
 0x1b1   : > { %350 = vmax.xlane.f32.xlu1 %v349_v47 }
 0x1b9   : > { %344 = vmax.xlane.f32.xlu1 %v343_v48 }
 0x204   : > { %v357_v49 = vpop.xlane.xlu2 %356 }
 0x205   : > { %v369_v50 = vmax.f32 %v357_v49, 100.0 }
 0x207   : > { %v401_v51 = vsub.f32 100.0, %v369_v50  ;;  %v556_v52 = vsub.f32 %v357_v49, %v369_v50  ;;  %v377_v19 = vsub.f32 %v940_v36, %v369_v50 }
 0x209   : > { %v414_v53 = vmul.f32 1.442695, %v401_v51  ;;  %v569_v54 = vmul.f32 1.442695, %v556_v52  ;;  %v390_v30 = vmul.f32 1.442695, %v377_v19 }
 0x20b   : > { %779 = vpow2.f32 %v414_v53 }
 0x20c   : > { %v348_v55 = vpop.xlane.xlu2 %347  ;;  %v360_v56 = vpop.xlane.xlu0 %359  ;;  %781 = vpow2.f32 %v569_v54 }
 0x20d   : > { %v366_v57 = vmax.f32 %v348_v55, 100.0  ;;  %v370_v58 = vmax.f32 %v360_v56, 100.0 }
 0x20f   : > { %v398_v59 = vsub.f32 100.0, %v366_v57  ;;  %v553_v60 = vsub.f32 %v348_v55, %v366_v57  ;;  %v402_v61 = vsub.f32 100.0, %v370_v58  ;;  %v557_v62 = vsub.f32 %v360_v56, %v370_v58 }
 0x210   : > { %v378_v8 = vsub.f32 %v334_v39, %v370_v58  ;;  %v374_v15 = vsub.f32 %v944_v38, %v366_v57 }
 0x211   : > { %v408_v63 = vmul.f32 1.442695, %v398_v59  ;;  %v563_v0 = vmul.f32 1.442695, %v553_v60  ;;  %v960_v1 = vpop.eup %779  ;;  %v416_v3 = vmul.f32 1.442695, %v402_v61 }
 0x212   : > { %v962_v2 = vpop.eup %781  ;;  %v571_v4 = vmul.f32 1.442695, %v557_v62  ;;  %v392_v16 = vmul.f32 1.442695, %v378_v8  ;;  %v384_v27 = vmul.f32 1.442695, %v374_v15 }
 0x213   : > { %783 = vpow2.f32 %v408_v63  ;;  %v580_v7 = vmax.f32 %v962_v2, %v960_v1 }
 0x214   : > { %v964_v5 = vpop.xlane.xlu2 %341  ;;  %v363_v6 = vpop.xlane.xlu1 %362  ;;  %785 = vpow2.f32 %v563_v0 }
 0x215   : > { %v969_v9 = vmax.f32 %v964_v5, 100.0  ;;  %v371_v10 = vmax.f32 %v363_v6, 100.0  ;;  %787 = vpow2.f32 %v416_v3 }
 0x216   : > { %789 = vpow2.f32 %v571_v4 }
 0x217   : > { %v372_v11 = vsub.f32 %v934_v33, %v969_v9  ;;  %v379_v12 = vsub.f32 %v336_v42, %v371_v10  ;;  %v403_v13 = vsub.f32 100.0, %v371_v10  ;;  %v558_v14 = vsub.f32 %v363_v6, %v371_v10 }
 0x219   : > { %v380_v17 = vmul.f32 1.442695, %v372_v11  ;;  %v974_v18 = vpop.eup %783  ;;  %v394_v20 = vmul.f32 1.442695, %v379_v12  ;;  %v418_v22 = vmul.f32 1.442695, %v403_v13 }
 0x21a   : > { %v977_v21 = vpop.eup %785  ;;  %v573_v23 = vmul.f32 1.442695, %v558_v14 }
 0x21b   : > { %791 = vpow2.f32 %v380_v17  ;;  %v577_v25 = vmax.f32 %v977_v21, %v974_v18  ;;  %v981_v26 = vpop.eup %787 }
 0x21c   : > { %v354_v24 = vpop.xlane.xlu1 %353  ;;  %793 = vpow2.f32 %v392_v16  ;;  %v983_v29 = vpop.eup %789 }
 0x21d   : > { %v368_v28 = vmax.f32 %v354_v24, 100.0  ;;  %795 = vpow2.f32 %v394_v20  ;;  %v581_v36 = vmax.f32 %v983_v29, %v981_v26 }
 0x21e   : > { %797 = vpow2.f32 %v418_v22 }
 0x21f   : > { %v376_v31 = vsub.f32 %v936_v34, %v368_v28  ;;  %v400_v32 = vsub.f32 100.0, %v368_v28  ;;  %v555_v33 = vsub.f32 %v354_v24, %v368_v28  ;;  %799 = vpow2.f32 %v573_v23 }
 0x220   : > { %801 = vpow2.f32 %v384_v27  ;;  %v396_v28 = vsub.f32 100.0, %v969_v9 }
 0x221   : > { %v792_v37 = vpop.eup %791  ;;  %v388_v38 = vmul.f32 1.442695, %v376_v31  ;;  %v412_v39 = vmul.f32 1.442695, %v400_v32  ;;  %v567_v40 = vmul.f32 1.442695, %v555_v33  ;;  %803 = vpow2.f32 %v390_v30 }
 0x222   : > { %v420_v41 = vsel %vm339_vm7, %v792_v37, 0.0  ;;  %v794_v42 = vpop.eup %793  ;;  %v551_v30 = vsub.f32 %v964_v5, %v969_v9  ;;  %v404_v31 = vmul.f32 1.442695, %v396_v28 }
 0x223   : > { %805 = vpow2.f32 %v388_v38  ;;  %421 = vadd.xlane.f32.xlu2 %v420_v41  ;;  %v796_v43 = vpop.eup %795  ;;  %v438_v19 = vsel %vm339_vm7, %v794_v42, 0.0 }
 0x224   : > { %807 = vpow2.f32 %v412_v39  ;;  %v351_v34 = vpop.xlane.xlu1 %350  ;;  %v989_v44 = vpop.eup %797  ;;  %v488_v47 = vpack.c.bf16 %v796_v43, %v794_v42  ;;  %v441_v27 = vsel %vm339_vm7, %v796_v43, 0.0  ;;  %v559_v32 = vmul.f32 1.442695, %v551_v30 }
 0x225   : > { %809 = vpow2.f32 %v567_v40  ;;  %v367_v45 = vmax.f32 %v351_v34, 100.0  ;;  %v991_v48 = vpop.eup %799 }
 0x226   : > { %v802_v49 = vpop.eup %801  ;;  %v502_v53 = vsel %vm339_vm7, %v488_v47, 0  ;;  %v582_v55 = vmax.f32 %v991_v48, %v989_v44 }
 0x227   : > { %v375_v50 = vsub.f32 %v954_v46, %v367_v45  ;;  %v399_v51 = vsub.f32 100.0, %v367_v45  ;;  %v554_v52 = vsub.f32 %v351_v34, %v367_v45  ;;  %v804_v54 = vpop.eup %803  ;;  %508 = vmatpush.bf16.xpose.msra.mxu1 %v502_v53  ;;  %v426_v61 = vsel %vm339_vm7, %v802_v49, 0.0 }
 0x228   : > { %v435_v24 = vsel %vm339_vm7, %v804_v54, 0.0 }
 0x229   : > { %v806_v56 = vpop.eup %805  ;;  %v386_v57 = vmul.f32 1.442695, %v375_v50  ;;  %v410_v58 = vmul.f32 1.442695, %v399_v51  ;;  %v565_v59 = vmul.f32 1.442695, %v554_v52 }
 0x22a   : > { %v997_v60 = vpop.eup %807  ;;  %v487_v62 = vpack.c.bf16 %v804_v54, %v806_v56  ;;  %v432_v12 = vsel %vm339_vm7, %v806_v56, 0.0  ;;  %v484_v52 = vld [vmem:[%s931_s28] sm:$0x7] }
 0x22b   : > { %v1000_v63 = vpop.eup %809  ;;  %811 = vpow2.f32 %v386_v57  ;;  %427 = vadd.xlane.f32.xlu2 %v426_v61 }
 0x22c   : > { %813 = vpow2.f32 %v410_v58  ;;  %v345_v46 = vpop.xlane.xlu1 %344  ;;  %v579_v0 = vmax.f32 %v1000_v63, %v997_v60  ;;  %v499_v4 = vsel %vm339_vm7, %v487_v62, 0 }
 0x22d   : > { %815 = vpow2.f32 %v565_v59  ;;  %v365_v3 = vmax.f32 %v345_v46, 100.0 }
 0x22f   : > { %v373_v6 = vsub.f32 %v938_v35, %v365_v3  ;;  %509 = vmatpush.bf16.xpose.msra.mxu1 %v499_v4  ;;  %v397_v33 = vsub.f32 100.0, %v365_v3 }
 0x231   : > { %v812_v8 = vpop.eup %811  ;;  %v382_v10 = vmul.f32 1.442695, %v373_v6  ;;  %v406_v38 = vmul.f32 1.442695, %v397_v33 }
 0x232   : > { %v1006_v11 = vpop.eup %813  ;;  %v486_v13 = vpack.c.bf16 %v812_v8, %v802_v49  ;;  %v429_v23 = vsel %vm339_vm7, %v812_v8, 0.0 }
 0x233   : > { %v816_v14 = vpop.eup %815  ;;  %817 = vpow2.f32 %v382_v10  ;;  %433 = vadd.xlane.f32.xlu2 %v432_v12 }
 0x234   : > { %v578_v15 = vmax.f32 %v816_v14, %v1006_v11  ;;  %v496_v16 = vsel %vm339_vm7, %v486_v13, 0  ;;  %819 = vpow2.f32 %v404_v31 }
 0x235   : > { %821 = vpow2.f32 %v559_v32 }
 0x236   : > { %823 = vpow2.f32 %v406_v38 }
 0x237   : > { %510 = vmatpush.bf16.xpose.msra.mxu1 %v496_v16 }
 0x239   : > { %v818_v17 = vpop.eup %817 }
 0x23a   : > { %v423_v35 = vsel %vm339_vm7, %v818_v17, 0.0  ;;  %v485_v20 = vpack.c.bf16 %v818_v17, %v792_v37  ;;  %v552_v37 = vsub.f32 %v345_v46, %v365_v3  ;;  %v820_v40 = vpop.eup %819 }
 0x23b   : > { %439 = vadd.xlane.f32.xlu2 %v438_v19  ;;  %424 = vadd.xlane.f32.xlu1 %v423_v35  ;;  %v822_v41 = vpop.eup %821 }
 0x23c   : > { %v493_v22 = vsel %vm339_vm7, %v485_v20, 0  ;;  %v561_v39 = vmul.f32 1.442695, %v552_v37  ;;  %v575_v42 = vmax.f32 %v822_v41, %v820_v40  ;;  %v824_v43 = vpop.eup %823 }
 0x23e   : > { %825 = vpow2.f32 %v561_v39 }
 0x23f   : > { %511 = vmatpush.bf16.xpose.msra.mxu1 %v493_v22 }
 0x243   : > { %430 = vadd.xlane.f32.xlu1 %v429_v23 }
 0x244   : > { %v826_v34 = vpop.eup %825 }
 0x245   : > { %v576_v45 = vmax.f32 %v826_v34, %v824_v43 }
 0x246   : > { %747 = vmatmul.msk.bf16.vlgmr.msra.gmra.mxu1 %vm339_vm7, %v484_v52 }
 0x24b   : > { %436 = vadd.xlane.f32.xlu1 %v435_v24 }
 0x253   : > { %442 = vadd.xlane.f32.xlu1 %v441_v27 }
 0x28d   : > { %583 = vxpose.xlu1.b32.start [1/8] (short) (narrow) %v575_v42, 8 }
 0x295   : > { %584 = vxpose.xlu1.b32.cont [2/8] (short) (narrow) %v576_v45, 8 }
 0x296   : > { %v422_v5 = vpop.xlane.xlu2 %421 }
 0x297   : > { %v444_v9 = vadd.f32 %v820_v40, %v422_v5 }
 0x299   : > { %827 = vrcp.f32 %v444_v9 }
 0x29d   : > { %585 = vxpose.xlu1.b32.cont [3/8] (short) (narrow) %v577_v25, 8 }
 0x29e   : > { %v428_v53 = vpop.xlane.xlu2 %427 }
 0x29f   : > { %v828_v47 = vpop.eup %827  ;;  %v446_v57 = vadd.f32 %v974_v18, %v428_v53 }
 0x2a0   : > { %v460_v49 = vmul.f32 %v828_v47, %v444_v9 }
 0x2a2   : > { %v468_v50 = vsub.f32 2.0, %v460_v49 }
 0x2a4   : > { %v476_v51 = vmul.f32 %v828_v47, %v468_v50 }
 0x2a5   : > { %586 = vxpose.xlu1.b32.cont [4/8] (short) (narrow) %v578_v15, 8 }
 0x2a6   : > { %517 = vxpose.xlu2.b32.start [1/8] (short) (narrow) %v476_v51, 8  ;;  %v434_v46 = vpop.xlane.xlu2 %433 }
 0x2ad   : > { %587 = vxpose.xlu1.b32.cont [5/8] (short) (narrow) %v579_v0, 8  ;;  %v448_v0 = vadd.f32 %v997_v60, %v434_v46 }
 0x2ae   : > { %v425_v54 = vpop.xlane.xlu1 %424 }
 0x2af   : > { %v445_v56 = vadd.f32 %v824_v43, %v425_v54 }
 0x2b1   : > { %829 = vrcp.f32 %v445_v56 }
 0x2b2   : > { %831 = vrcp.f32 %v446_v57 }
 0x2b5   : > { %588 = vxpose.xlu1.b32.cont [6/8] (short) (narrow) %v580_v7, 8 }
 0x2b6   : > { %v431_v21 = vpop.xlane.xlu1 %430 }
 0x2b7   : > { %v830_v25 = vpop.eup %829  ;;  %v447_v58 = vadd.f32 %v1006_v11, %v431_v21  ;;  %v440_v11 = vpop.xlane.xlu2 %439 }
 0x2b8   : > { %v461_v59 = vmul.f32 %v830_v25, %v445_v56  ;;  %v832_v61 = vpop.eup %831  ;;  %v450_v60 = vadd.f32 %v981_v26, %v440_v11 }
 0x2b9   : > { %833 = vrcp.f32 %v447_v58  ;;  %v462_v63 = vmul.f32 %v832_v61, %v446_v57 }
 0x2ba   : > { %v469_v62 = vsub.f32 2.0, %v461_v59  ;;  %835 = vrcp.f32 %v448_v0 }
 0x2bb   : > { %v470_v2 = vsub.f32 2.0, %v462_v63 }
 0x2bc   : > { %v477_v18 = vmul.f32 %v830_v25, %v469_v62 }
 0x2bd   : > { %589 = vxpose.xlu1.b32.cont [7/8] (short) (narrow) %v581_v36, 8  ;;  %v478_v6 = vmul.f32 %v832_v61, %v470_v2 }
 0x2be   : > { %518 = vxpose.xlu2.b32.cont [2/8] (short) (narrow) %v477_v18, 8  ;;  %v437_v4 = vpop.xlane.xlu1 %436 }
 0x2bf   : > { %v834_v7 = vpop.eup %833  ;;  %v449_v8 = vadd.f32 %v960_v1, %v437_v4 }
 0x2c0   : > { %v463_v3 = vmul.f32 %v834_v7, %v447_v58  ;;  %v836_v29 = vpop.eup %835 }
 0x2c1   : > { %837 = vrcp.f32 %v449_v8  ;;  %v464_v36 = vmul.f32 %v836_v29, %v448_v0 }
 0x2c2   : > { %v471_v10 = vsub.f32 2.0, %v463_v3  ;;  %839 = vrcp.f32 %v450_v60 }
 0x2c3   : > { %v472_v13 = vsub.f32 2.0, %v464_v36  ;;  %v513_v28 = vpop.f32.mrf.mxu1 }
 0x2c4   : > { %v479_v12 = vmul.f32 %v834_v7, %v471_v10 }
 0x2c5   : > { %590 = vxpose.xlu1.b32.end [8/8] (short) (narrow) %v582_v55, 8  ;;  %v480_v48 = vmul.f32 %v836_v29, %v472_v13 }
 0x2c6   : > { %519 = vxpose.xlu2.b32.cont [3/8] (short) (narrow) %v478_v6, 8  ;;  %v443_v16 = vpop.xlane.xlu1 %442 }
 0x2c7   : > { %v838_v14 = vpop.eup %837  ;;  %v451_v55 = vadd.f32 %v989_v44, %v443_v16 }
 0x2c8   : > { %v465_v15 = vmul.f32 %v838_v14, %v449_v8  ;;  %v840_v1 = vpop.eup %839 }
 0x2c9   : > { %841 = vrcp.f32 %v451_v55  ;;  %v466_v19 = vmul.f32 %v840_v1, %v450_v60 }
 0x2ca   : > { %v473_v17 = vsub.f32 2.0, %v465_v15 }
 0x2cb   : > { %v474_v20 = vsub.f32 2.0, %v466_v19  ;;  %v515_v30 = vpop.f32.mrf.mxu1 }
 0x2cc   : > { %v481_v35 = vmul.f32 %v838_v14, %v473_v17 }
 0x2cd   : > { %v482_v26 = vmul.f32 %v840_v1, %v474_v20 }
 0x2ce   : > { %520 = vxpose.xlu2.b32.cont [4/8] (short) (narrow) %v479_v12, 8 }
 0x2cf   : > { %v842_v22 = vpop.eup %841 }
 0x2d0   : > { %v467_v23 = vmul.f32 %v842_v22, %v451_v55 }
 0x2d2   : > { %v475_v24 = vsub.f32 2.0, %v467_v23 }
 0x2d4   : > { %v483_v27 = vmul.f32 %v842_v22, %v475_v24 }
 0x2d6   : > { %521 = vxpose.xlu2.b32.cont [5/8] (short) (narrow) %v480_v48, 8 }
 0x2de   : > { %522 = vxpose.xlu2.b32.cont [6/8] (short) (narrow) %v481_v35, 8 }
 0x2e6   : > { %523 = vxpose.xlu2.b32.cont [7/8] (short) (narrow) %v482_v26, 8 }
 0x2ee   : > { %524 = vxpose.xlu2.b32.end [8/8] (short) (narrow) %v483_v27, 8 }
 0x331   : > { %v599_v44 = vpop.trf.xlu1 }
 0x34f   : > { %v533_v31 = vpop.trf.xlu2 }
 0x350   : > { %v549_v32 = vperm.slane %v533_v31, 0  ;;  %v615_v33 = vmul.f32 %v599_v44, %v533_v31 }
 0x352   : > { %v550_v37 = vmul.f32 %v549_v32, %v513_v28  ;;  %624 = vst.msk [vmem:[%s918_s23 + $0xc] sm:$0x1] %vm623_vm8, %v615_v33 }
 0x354   : > { %617 = vst.msk [vmem:[%s918_s23 + $0x4] sm:$0xf] %vm236_vm0, %v550_v37 }
 0x355   : > { %619 = vst.msk [vmem:[%s918_s23 + $0x4] sm:$0x30] %vm618_vm9, %v550_v37 }
 0x356 PF: > { %s13_s14 = sadd.s32 1, %s865_s14   ;;  %s1057_s12 = smov %s861_s13 }
 0x357   : > { %p10_p5 = scmp.ge.s32.totalorder %s13_s14, 4   ;;  %s1058_s13 = smov %s1060_s15 }
 0x359   :  { %12 = sbr.rel (!%p10_p5) target bundleno = 2 (0x2), region = 68 }

</bundles_post_ra>
